<compile_context>
chip_gen: v7x
topology: tpu7x:2x2x1
jax: 0.10.0
libtpu: 0.0.40
codegen_flags: <defaults>
</compile_context>

<pallas_src>
import functools

import jax
import jax.numpy as jnp
from jax.experimental import pallas as pl
from jax.experimental.pallas import tpu as pltpu

BN_EPS = 1e-5


def _parallel():
    return pltpu.CompilerParams(dimension_semantics=("parallel",))


def _pick_batch(N, per_image_bytes, budget_bytes=4 << 20):
    """Images per grid step: amortize ~0.35us/step overhead, keep >=2 grid steps
    (v7x megacore), stay well under default scoped VMEM with double buffering."""
    b = max(1, min(N, int(budget_bytes // max(per_image_bytes, 1))))
    if N >= 2:
        b = max(1, min(b, N // 2))
    while N % b:
        b -= 1
    return b


def _col_masks(H, W):
    """(2, (H+2)*W) f32 masks zeroing the wrapped-around column of the dw=0 / dw=2
    lane-shifted slabs (W-dimension halo handled by masking instead of padding)."""
    col = jnp.arange((H + 2) * W, dtype=jnp.int32) % W
    left = (col != 0).astype(jnp.float32)
    right = (col != W - 1).astype(jnp.float32)
    return jnp.stack([left, right], axis=0)


# ----------------------------- in-kernel helpers ---------------------------

def _conv_block(x, w, masks, H, W, KH, KW):
    """ReLU + conv (stride 1, 'same') on a (B, C, H*W) NCHW-flat block.

    x: (B, C, H*W) f32 | w: (C_out, KH*KW*C) bf16 | masks: (2, (H+2)*W) f32.
    Returns pre-BN y: (B, C_out, H*W) f32.  Pixels stay on the lane axis, so the
    result is already in NCHW order and no transpose is ever needed.
    """
    B, C, HW = x.shape
    xr = jnp.maximum(x, 0.0)                                   # ReLU once
    if KH == 1 and KW == 1:
        patch = xr.astype(jnp.bfloat16)                        # (B, C, HW)
    else:
        assert KH == 3 and KW == 3, "NB-201 only uses 1x1 / 3x3 convs"
        HWp = (H + 2) * W
        zpad = jnp.zeros((B, C, W + 1), xr.dtype)              # H-halo + 1-elem guard
        xf = jnp.concatenate([zpad, xr, zpad], axis=-1)        # (B, C, HW + 2W + 2)
        slabs = []
        for dw in range(3):
            g = xf[:, :, dw:dw + HWp]
            if dw == 0:
                g = g * masks[0:1, :].reshape(1, 1, HWp)
            elif dw == 2:
                g = g * masks[1:2, :].reshape(1, 1, HWp)
            slabs.append(g.astype(jnp.bfloat16))
        taps = [slabs[dw][:, :, dh * W:dh * W + HW]
                for dh in range(3) for dw in range(3)]
        patch = jnp.concatenate(taps, axis=1)                  # (B, 9C, HW): fused K
    # One MXU matmul per image; tap accumulation lives inside the matmul (MRB on v7x).
    ys = [jnp.dot(w, patch[b], preferred_element_type=jnp.float32) for b in range(B)]
    return jnp.stack(ys, axis=0)                               # (B, C_out, HW) f32


def _conv_stats_kernel(x_ref, w_ref, m_ref, st_ref, *, H, W, KH, KW):
    """Pass 1: conv -> per-block per-channel (sum, block-centered sum-of-squares)."""
    y = _conv_block(x_ref[...], w_ref[...], m_ref[...], H, W, KH, KW)
    B, C_out, HW = y.shape
    npix = B * HW
    s1 = jnp.sum(jnp.sum(y, axis=2, keepdims=True), axis=0)    # (C_out, 1)
    mb = s1 * (1.0 / npix)                                     # block mean
    d = y - mb[None]
    m2 = jnp.sum(jnp.sum(d * d, axis=2, keepdims=True), axis=0)  # (C_out, 1)
    st_ref[0] = jnp.concatenate([s1, m2], axis=1)              # (C_out, 2)


def _conv_apply_kernel(x_ref, w_ref, m_ref, mi_ref, o_ref, *, H, W, KH, KW):
    """Pass 2: recompute conv, apply BN, write NCHW-flat output directly."""
    y = _conv_block(x_ref[...], w_ref[...], m_ref[...], H, W, KH, KW)
    mi = mi_ref[...]                                           # (C_out, 2)
    mean = mi[:, 0:1]
    inv = mi[:, 1:2]
    o_ref[...] = ((y - mean[None]) * inv[None]).astype(o_ref.dtype)


def _avgpool_kernel(x_ref, m_ref, rc_ref, o_ref, *, H, W):
    """AvgPool2d(3, stride=1, pad=1, count_include_pad=False) on NCHW-flat blocks."""
    x = x_ref[...]                                             # (B, C, HW)
    B, C, HW = x.shape
    HWp = (H + 2) * W
    m = m_ref[...]
    zpad = jnp.zeros((B, C, W + 1), x.dtype)
    xf = jnp.concatenate([zpad, x, zpad], axis=-1)
    slabs = []
    for dw in range(3):
        g = xf[:, :, dw:dw + HWp]
        if dw == 0:
            g = g * m[0:1, :].reshape(1, 1, HWp)
        elif dw == 2:
            g = g * m[1:2, :].reshape(1, 1, HWp)
        slabs.append(g)
    acc = jnp.zeros((B, C, HW), jnp.float32)
    for dh in range(3):
        for dw in range(3):
            acc = acc + slabs[dw][:, :, dh * W:dh * W + HW]
    o_ref[...] = (acc * rc_ref[...].reshape(1, 1, HW)).astype(o_ref.dtype)


# ----------------------------- wrappers ------------------------------------

def _relu_conv_bn(x_nchw, w_oihw):
    """Fused ReLU -> Conv2d(bias=False, stride 1, 'same') -> BatchNorm(affine=False,
    batch statistics).  Two passes over raw NCHW x (stats, then recompute+apply)."""
    N, C, H, W = x_nchw.shape
    C_out, _, KH, KW = w_oihw.shape
    HW, HWp = H * W, (H + 2) * W
    K = KH * KW * C

    x_flat = x_nchw.reshape(N, C, HW)                          # free bitcast, no HBM pass
    # (C_out, C, KH, KW) -> (C_out, KH*KW*C): w_mat[co, (kh*KW+kw)*C + ci] = w[co,ci,kh,kw]
    w_mat = jnp.transpose(w_oihw, (0, 2, 3, 1)).reshape(C_out, K).astype(jnp.bfloat16)
    masks = _col_masks(H, W)                                   # (2, HWp), tiny constant

    per_img = 4 * C * HW + 2 * 3 * C * HWp + 2 * K * HW + 4 * C_out * HW
    B = _pick_batch(N, per_img)
    nblk = N // B

    x_spec = pl.BlockSpec((B, C, HW), lambda i: (i, 0, 0))
    w_spec = pl.BlockSpec((C_out, K), lambda i: (0, 0))
    m_spec = pl.BlockSpec((2, HWp), lambda i: (0, 0))

    stats = pl.pallas_call(
        functools.partial(_conv_stats_kernel, H=H, W=W, KH=KH, KW=KW),
        out_shape=jax.ShapeDtypeStruct((nblk, C_out, 2), jnp.float32),
        grid=(nblk,),
        in_specs=[x_spec, w_spec, m_spec],
        out_specs=pl.BlockSpec((1, C_out, 2), lambda i: (i, 0, 0)),
        compiler_params=_parallel(),
    )(x_flat, w_mat, masks)

    # Tiny cross-block reduction (nblk*C_out*2 floats): exact parallel-variance merge.
    n_blk = B * HW
    n_tot = N * HW
    s1, m2 = stats[:, :, 0], stats[:, :, 1]                    # (nblk, C_out)
    mean = jnp.sum(s1, axis=0) / n_tot
    mb = s1 / n_blk
    M2 = jnp.sum(m2, axis=0) + n_blk * jnp.sum(jnp.square(mb - mean[None, :]), axis=0)
    var = jnp.maximum(M2 / n_tot, 0.0)                         # biased var (train-mode BN)
    inv = jax.lax.rsqrt(var + BN_EPS)
    mi = jnp.stack([mean, inv], axis=1)                        # (C_out, 2)

    out = pl.pallas_call(
        functools.partial(_conv_apply_kernel, H=H, W=W, KH=KH, KW=KW),
        out_shape=jax.ShapeDtypeStruct((N, C_out, HW), x_nchw.dtype),
        grid=(nblk,),
        in_specs=[x_spec, w_spec, m_spec,
                  pl.BlockSpec((C_out, 2), lambda i: (0, 0))],
        out_specs=pl.BlockSpec((B, C_out, HW), lambda i: (i, 0, 0)),
        compiler_params=_parallel(),
    )(x_flat, w_mat, masks, mi)

    return out.reshape(N, C_out, H, W)                         # free bitcast back to NCHW


def _avg_pool_3x3(x_nchw):
    N, C, H, W = x_nchw.shape
    HW, HWp = H * W, (H + 2) * W
    x_flat = x_nchw.reshape(N, C, HW)
    masks = _col_masks(H, W)
    ones = jnp.pad(jnp.ones((H, W), jnp.float32), ((1, 1), (1, 1)))
    cnt = sum(ones[dh:dh + H, dw:dw + W] for dh in range(3) for dw in range(3))
    rcnt = (1.0 / cnt).reshape(1, HW)                          # static reciprocal counts

    per_img = 4 * C * (3 * HW + 3 * HWp)
    B = _pick_batch(N, per_img)
    nblk = N // B

    y = pl.pallas_call(
        functools.partial(_avgpool_kernel, H=H, W=W),
        out_shape=jax.ShapeDtypeStruct((N, C, HW), x_nchw.dtype),
        grid=(nblk,),
        in_specs=[pl.BlockSpec((B, C, HW), lambda i: (i, 0, 0)),
                  pl.BlockSpec((2, HWp), lambda i: (0, 0)),
                  pl.BlockSpec((1, HW), lambda i: (0, 0))],
        out_specs=pl.BlockSpec((B, C, HW), lambda i: (i, 0, 0)),
        compiler_params=_parallel(),
    )(x_flat, masks, rcnt)
    return y.reshape(N, C, H, W)


# ----------------------------- module port ---------------------------------

class NB201SharedOpPallas:
    """JAX/Pallas port of aw_nas NB201SharedOp.forward(x, op_type).

    Standard NB-201 configuration: stride=1, C == C_out, bn_affine=False
    (BatchNorm with no learnable params; training-mode batch statistics).
    """

    PRIMITIVES = ("none", "skip_connect", "nor_conv_1x1", "nor_conv_3x3",
                  "avg_pool_3x3")

    def __init__(self, C, C_out, stride, key, primitives=None):
        # TODO(synk): strided Zero / FactorizedReduce skip-connect (stride > 1 or
        # C != C_out) are not implemented; NB-201 cell edges always use stride=1.
        assert stride == 1 and C == C_out
        if primitives is not None:
            self.PRIMITIVES = tuple(primitives)
        self.C, self.C_out, self.stride = C, C_out, stride
        k1, k2 = jax.random.split(key)
        # Conv weights (bias=False), uniform(-1/sqrt(fan_in), 1/sqrt(fan_in)) init.
        bound1 = 1.0 / float(C * 1 * 1) ** 0.5
        bound3 = 1.0 / float(C * 3 * 3) ** 0.5
        self.w1 = jax.random.uniform(k1, (C_out, C, 1, 1), jnp.float32, -bound1, bound1)
        self.w3 = jax.random.uniform(k2, (C_out, C, 3, 3), jnp.float32, -bound3, bound3)

    def __call__(self, x, op_type):
        prim = self.PRIMITIVES[op_type]
        if prim == "none":
            return jnp.zeros_like(x)          # never read x
        if prim == "skip_connect":
            return x                          # identity, no copy
        if prim == "nor_conv_1x1":
            return _relu_conv_bn(x, self.w1)
        if prim == "nor_conv_3x3":
            return _relu_conv_bn(x, self.w3)
        if prim == "avg_pool_3x3":
            return _avg_pool_3x3(x)
        raise ValueError(f"unknown primitive {prim}")


# ----------------------------- test ----------------------------------------

if __name__ == "__main__":
    key = jax.random.PRNGKey(0)
    kx, kp = jax.random.split(key)
    x = jax.random.normal(kx, (2, 4, 16, 16), dtype=jnp.float32)   # NCHW, like PyTorch
    op = NB201SharedOpPallas(C=4, C_out=4, stride=1, key=kp)

    # --- pure-JAX references (f32) for a sanity check -----------------------
    def ref_conv(xx, ww, pad):
        xr = jnp.maximum(xx, 0.0)
        y = jax.lax.conv_general_dilated(
            xr, ww, window_strides=(1, 1), padding=[(pad, pad), (pad, pad)],
            dimension_numbers=("NCHW", "OIHW", "NCHW"),
            precision=jax.lax.Precision.HIGHEST)
        mean = jnp.mean(y, axis=(0, 2, 3), keepdims=True)
        var = jnp.mean(jnp.square(y - mean), axis=(0, 2, 3), keepdims=True)
        return (y - mean) * jax.lax.rsqrt(var + BN_EPS)

    def ref_pool(xx):
        N, C, H, W = xx.shape
        xp = jnp.pad(xx, ((0, 0), (0, 0), (1, 1), (1, 1)))
        s = sum(xp[:, :, dh:dh + H, dw:dw + W] for dh in range(3) for dw in range(3))
        ones = jnp.pad(jnp.ones((H, W), jnp.float32), ((1, 1), (1, 1)))
        cnt = sum(ones[dh:dh + H, dw:dw + W] for dh in range(3) for dw in range(3))
        return s / cnt

    refs = {
        "none": jnp.zeros_like(x),
        "skip_connect": x,
        "nor_conv_1x1": ref_conv(x, op.w1, 0),
        "nor_conv_3x3": ref_conv(x, op.w3, 1),
        "avg_pool_3x3": ref_pool(x),
    }
    # bf16 MXU operands (f32 accumulate) give ~1e-2-scale deltas on the normalized convs.
    tols = {"none": 1e-6, "skip_connect": 1e-6, "nor_conv_1x1": 1e-1,
            "nor_conv_3x3": 1e-1, "avg_pool_3x3": 1e-4}

    for op_type, name in enumerate(op.PRIMITIVES):
        y = jax.block_until_ready(op(x, op_type))
        assert y.shape == (2, 4, 16, 16), (name, y.shape)
        assert y.dtype == jnp.float32, (name, y.dtype)
        err = float(jnp.max(jnp.abs(y - refs[name])))
        assert err < tols[name], (name, err)

    print("KERNEL_OK")
</pallas_src>

<mosaic_0001>
module attributes {stable_mosaic.version = 11 : i64} {
  func.func @_conv_stats_kernel(%arg0: i32, %arg1: memref<1x4x256xf32, #tpu.memory_space<vmem>>, %arg2: memref<4x4xbf16, #tpu.memory_space<vmem>>, %arg3: memref<2x288xf32, #tpu.memory_space<vmem>>, %arg4: memref<1x4x2xf32, #tpu.memory_space<vmem>>) attributes {dimension_semantics = [#tpu.dimension_semantics<parallel>], iteration_bounds = array<i64: 2>, scalar_prefetch = 0 : i64, scratch_operands = 0 : i64, tpu.core_type = #tpu.core_type<tc>, window_params = [{transform_indices = @transform_0, window_bounds = array<i64: 1, 4, 256>}, {pipeline_mode = #tpu.pipeline_mode<synchronous>, transform_indices = @transform_1, window_bounds = array<i64: 4, 4>}, {pipeline_mode = #tpu.pipeline_mode<synchronous>, transform_indices = @transform_2, window_bounds = array<i64: 2, 288>}, {transform_indices = @transform_3, window_bounds = array<i64: 1, 4, 2>}]} {
    %c0 = arith.constant 0 : index
    %c0_0 = arith.constant 0 : index
    %c0_1 = arith.constant 0 : index
    %0 = vector.load %arg1[%c0, %c0_0, %c0_1] : memref<1x4x256xf32, #tpu.memory_space<vmem>>, vector<1x4x256xf32>
    %c0_2 = arith.constant 0 : index
    %c0_3 = arith.constant 0 : index
    %1 = vector.load %arg2[%c0_2, %c0_3] : memref<4x4xbf16, #tpu.memory_space<vmem>>, vector<4x4xbf16>
    %cst = arith.constant 0.000000e+00 : f32
    %2 = vector.broadcast %cst : f32 to vector<1x4x256xf32>
    %3 = arith.maximumf %0, %2 : vector<1x4x256xf32>
    %4 = arith.truncf %3 : vector<1x4x256xf32> to vector<1x4x256xbf16>
    %5 = vector.shape_cast %4 : vector<1x4x256xbf16> to vector<4x256xbf16>
    %cst_4 = arith.constant dense<0.000000e+00> : vector<4x256xf32>
    %6 = tpu.matmul %1, %5, %cst_4 {dimension_numbers = #tpu.dot_dimension_numbers<[1], [0], [0], [1], [0, 0, 1, 1], [], []>} : vector<4x4xbf16>, vector<4x256xbf16>, vector<4x256xf32> -> vector<4x256xf32>
    %7 = vector.shape_cast %6 : vector<4x256xf32> to vector<1x4x256xf32>
    %cst_5 = arith.constant dense<0.000000e+00> : vector<1x4xf32>
    %8 = vector.multi_reduction <add>, %7, %cst_5 [2] : vector<1x4x256xf32> to vector<1x4xf32>
    %9 = vector.shape_cast %8 : vector<1x4xf32> to vector<1x4x1xf32>
    %cst_6 = arith.constant dense<0.000000e+00> : vector<4x1xf32>
    %10 = vector.multi_reduction <add>, %9, %cst_6 [0] : vector<1x4x1xf32> to vector<4x1xf32>
    %cst_7 = arith.constant 3.906250e-03 : f32
    %11 = vector.broadcast %cst_7 : f32 to vector<4x1xf32>
    %12 = arith.mulf %10, %11 : vector<4x1xf32>
    %13 = vector.shape_cast %12 : vector<4x1xf32> to vector<1x4x1xf32>
    %14 = vector.broadcast %13 : vector<1x4x1xf32> to vector<1x4x256xf32>
    %15 = arith.subf %7, %14 : vector<1x4x256xf32>
    %16 = arith.mulf %15, %15 : vector<1x4x256xf32>
    %cst_8 = arith.constant dense<0.000000e+00> : vector<1x4xf32>
    %17 = vector.multi_reduction <add>, %16, %cst_8 [2] : vector<1x4x256xf32> to vector<1x4xf32>
    %18 = vector.shape_cast %17 : vector<1x4xf32> to vector<1x4x1xf32>
    %cst_9 = arith.constant dense<0.000000e+00> : vector<4x1xf32>
    %19 = vector.multi_reduction <add>, %18, %cst_9 [0] : vector<1x4x1xf32> to vector<4x1xf32>
    %20 = tpu.concatenate %10, %19 in 1 : vector<4x1xf32>, vector<4x1xf32> -> vector<4x2xf32>
    %c0_10 = arith.constant 0 : index
    %c0_11 = arith.constant 0 : index
    %c0_12 = arith.constant 0 : index
    %21 = vector.load %arg4[%c0_10, %c0_11, %c0_12] : memref<1x4x2xf32, #tpu.memory_space<vmem>>, vector<1x4x2xf32>
    %22 = vector.shape_cast %21 : vector<1x4x2xf32> to vector<4x2xf32>
    %23 = vector.shape_cast %20 : vector<4x2xf32> to vector<1x4x2xf32>
    tpu.vector_store %arg4[%c0_10, %c0_11, %c0_12], %23 {strides = array<i32>} : memref<1x4x2xf32, #tpu.memory_space<vmem>>, vector<1x4x2xf32>,
    return
  }
  func.func @transform_0(%arg0: i32) -> (i32, i32, i32) {
    %c0_i32 = arith.constant 0 : i32
    %c0_i32_0 = arith.constant 0 : i32
    %c0_i32_1 = arith.constant 0 : i32
    return %arg0, %c0_i32, %c0_i32_0 : i32, i32, i32
  }
  func.func @transform_1(%arg0: i32) -> (i32, i32) {
    %c0_i32 = arith.constant 0 : i32
    %c0_i32_0 = arith.constant 0 : i32
    %c0_i32_1 = arith.constant 0 : i32
    return %c0_i32, %c0_i32_0 : i32, i32
  }
  func.func @transform_2(%arg0: i32) -> (i32, i32) {
    %c0_i32 = arith.constant 0 : i32
    %c0_i32_0 = arith.constant 0 : i32
    %c0_i32_1 = arith.constant 0 : i32
    return %c0_i32, %c0_i32_0 : i32, i32
  }
  func.func @transform_3(%arg0: i32) -> (i32, i32, i32) {
    %c0_i32 = arith.constant 0 : i32
    %c0_i32_0 = arith.constant 0 : i32
    %c0_i32_1 = arith.constant 0 : i32
    return %arg0, %c0_i32, %c0_i32_0 : i32, i32, i32
  }
}

</mosaic_0001>

<bundles_post_ra>
// kernel: tpu_custom_call.1
= control target key start
LH: loop header
LB: loop body
LE: loop exit
PB: predicated region body
PF: predicated region fallthrough
CT: control target
= control target key end

     0   :  { %8 = vsyncpa [#allocation3], 0  ;;  %s698_s0 = inlined_call_operand.hbm [shape: f32[2,4,256], index: 0, kind: input, shape index: {}]   ;;  %s699_s1 = inlined_call_operand.hbm [shape: bf16[4,4], index: 1, kind: input, shape index: {}]   ;;  %s700_s2 = inlined_call_operand.vmem [shape: f32[2,288], index: 2, kind: input, shape index: {}]   ;;  %s701_s3 = inlined_call_operand.vmem [shape: f32[2,4,2], index: 3, kind: output, shape index: {}]  }
   0x1   :  { %10 = vsyncpa [#allocation3 + $0x1], 0 }
   0x2   :  { %11 = vsyncpa [#allocation5], 0  ;;  %s546_s12 = smov 0   ;;  %s548_s13 = smov 0  }
   0x3   :  { %s550_s14 = smov 0   ;;  %s552_s15 = smov 0  }
   0x4 LB: > { %s565_s2 = sadd.s32 4294967295, %s521_s15   ;;  %p37_p0 = scmp.ne.s32.totalorder %s513_s13, %s509_s12  ;;  %s521_s15 = sphi %s552_s15, %s719_s15   ;;  %s517_s14 = sphi %s550_s14, %s718_s14   ;;  %s513_s13 = sphi %s548_s13, %s717_s13   ;;  %s509_s12 = sphi %s546_s12, %s716_s12  }
   0x5   : > { %p702_p1 = scmp.eq.s32.totalorder %s565_s2, 0  ;;  %p359_p2 = scmp.ge.s32.totalorder %s521_s15, 1 }
   0x6   : > { %p116_p3 = scmp.lt.s32.totalorder %s521_s15, 3  ;;  %s523_s18 = smov [#allocation4]  }
   0x7   : > { %p573_p4 = por %p702_p1, %p37_p0  ;;  %s129_s19 = sshll.u32 %s523_s18, 4  ;;  %s130_s19 = int_to_ptr.vmem [resolvable:$true] %s129_s19 }
   0x8   : > { %p577_p5 = pnand %p359_p2, %p116_p3  ;;  %s584_s20 = sadd.s32 1, %s521_s15  }
   0x9   : > { %s705_s16 = scalar_select %p573_p4, 1, 0 }
   0xa   : > { %s706_s17 = scalar_select %p577_p5, 1, 0 }
   0xb   : > { %p380_p6 = pneg %p577_p5  ;;  %s21_s22 = ssub.s32 %s521_s15, %s584_s20 }
   0xc   : > { %p594_p8 = scmp.eq.s32.totalorder %s21_s22, 0  ;;  %s24_s24 = sadd.s32 1, %s517_s14 }
   0xd   : > { %p588_p7 = pnand %p380_p6, %p702_p1  ;;  %s425_s27 = scalar_lea.hbm %s699_s1, 32 }
   0xe   : > { %s708_s23 = scalar_select %p594_p8, 1, 0 }
   0xf   : > { %p426_p10 = scmp.ne.s32.totalorder %s699_s1, %s425_s27  ;;  %p427_p11 = pneg %p588_p7 }
  0x10   : > { %p432_p0 = scmp.lt.u32.totalorder %s425_s27, %s699_s1 }
  0x11   : > { %p428_p12 = pnand %p427_p11, %p426_p10 }
  0x13   : > { %p429_p13 = pneg %p428_p12 }
  0x15   : > { %p434_p2 = pnand %p432_p0, %p429_p13 }
  0x17   : > { %437 = shalt.err (!%p434_p2)
}
  0x18   : > { %s438_s5 = scalar_lea.vmem %s130_s19, 32  ;;  %p446_p9 = scmp.lt.s32.totalorder %s130_s19, %s130_s19 }
  0x19   : > { %p439_p3 = scmp.ne.s32.totalorder %s130_s19, %s438_s5  ;;  %p447_p4 = scmp.lt.s32.totalorder %s438_s5, %s438_s5 }
  0x1b   : > { %p441_p6 = pnand %p439_p3, %p427_p11  ;;  %p448_p5 = por %p447_p4, %p446_p9 }
  0x1d   : > { %p442_p1 = pneg %p441_p6 }
  0x1f   : > { %p449_p8 = pnand %p448_p5, %p442_p1 }
  0x21   : > { %452 = shalt.err (!%p449_p8)
}
  0x22   : > { %383 = dma.hbm_to_vmem [thread:$0]  (!%p588_p7), %s699_s1, 32, %s130_s19, [#allocation5]  }
  0x23   : > { %p709_p10 = scmp.ne.s32.totalorder %s708_s23, 0  ;;  %p32_p4 = scmp.eq.s32.totalorder %s521_s15, 0 }
  0x24   : > { %p389_p1 = scmp.lt.s32.totalorder %s521_s15, 2  ;;  %s143_s9 = sand.u32 1, %s517_s14  }
  0x25   : > { %s620_s8 = scalar_select %p709_p10, %s517_s14, %s24_s24  }
  0x26   : > { %s373_s10 = sshll.u32 %s521_s15, 7  ;;  %p710_p5 = scmp.ne.s32.totalorder %s517_s14, %s513_s13 }
  0x27   : > { %s362_s11 = sshll.u32 %s143_s9, 3  ;;  %s632_s21 = scalar_lea.hbm %s698_s0, %s373_s10 }
  0x28   : > { %p33_p8 = por %p32_p4, %p710_p5  ;;  %s147_s22 = scalar_lea.vmem [#allocation2], %s362_s11 }
  0x29   : > { %s155_s15 = sshll.u32 %s147_s22, 4  ;;  %s144_s23 = scalar_lea.sflag [#allocation3], %s143_s9  ;;  %s638_s15 = int_to_ptr.vmem [resolvable:$true] %s155_s15 }
  0x2a   : > { %p634_p7 = pnand %p389_p1, %p33_p8  ;;  %s453_s24 = scalar_lea.hbm %s632_s21, 128 }
  0x2b   : > { %p454_p9 = scmp.ne.s32.totalorder %s632_s21, %s453_s24  ;;  %s458_s27 = scalar_lea.hbm %s698_s0, 256 }
  0x2c   : > { %p455_p11 = pneg %p634_p7  ;;  %p459_p0 = scmp.lt.u32.totalorder %s632_s21, %s698_s0 }
  0x2d   : > { %p460_p2 = scmp.lt.u32.totalorder %s458_s27, %s453_s24  ;;  %p462_p6 = scmp.lt.u32.totalorder %s453_s24, %s632_s21 }
  0x2e   : > { %p456_p12 = pnand %p455_p11, %p454_p9 }
  0x2f   : > { %p461_p3 = por %p460_p2, %p459_p0 }
  0x30   : > { %p457_p13 = pneg %p456_p12 }
  0x31   : > { %p463_p10 = por %p462_p6, %p461_p3 }
  0x33   : > { %p464_p4 = pnand %p463_p10, %p457_p13 }
  0x35   : > { %467 = shalt.err (!%p464_p4)
}
  0x36   : > { %s468_s30 = scalar_lea.vmem %s638_s15, 128  ;;  %s524_s4 = smov [#allocation2]  }
  0x37   : > { %p469_p1 = scmp.ne.s32.totalorder %s638_s15, %s468_s30  ;;  %s473_s5 = sshll.u32 %s524_s4, 4  ;;  %s474_s5 = int_to_ptr.vmem [resolvable:$false] %s473_s5 }
  0x38   : > { %s475_s6 = scalar_lea.vmem %s474_s5, 256  ;;  %p476_p9 = scmp.lt.s32.totalorder %s638_s15, %s474_s5 }
  0x39   : > { %p471_p5 = pnand %p469_p1, %p455_p11  ;;  %p477_p12 = scmp.lt.s32.totalorder %s475_s6, %s468_s30 }
  0x3b   : > { %p472_p8 = pneg %p471_p5  ;;  %p478_p0 = por %p477_p12, %p476_p9 }
  0x3d   : > { %p479_p2 = pnand %p478_p0, %p472_p8 }
  0x3f   : > { %482 = shalt.err (!%p479_p2)
}
  0x40   : > { %387 = dma.hbm_to_vmem [thread:$0]  (!%p634_p7), %s632_s21, 128, %s638_s15, %s144_s23  }
  0x41   : > { %p712_p13 = scmp.ne.s32.totalorder %s706_s17, 0 }
  0x42   : > { %s166_s7 = sand.u32 (!%p712_p13), 1, %s513_s13   ;;  %p713_p11 = scmp.ne.s32.totalorder (!%p712_p13), %s705_s16, 0 }
  0x43   : > { %164 = sbr.rel (%p712_p13) target bundleno = 600 (0x258), region = 32  ;;  %s366_s9 = sshll.u32 (!%p712_p13), %s166_s7, 3 }
  0x44   : > { %s167_s10 = scalar_lea.sflag (!%p712_p13), [#allocation3], %s166_s7  ;;  %s170_s11 = scalar_lea.vmem (!%p712_p13), [#allocation2], %s366_s9 }
  0x4a   : > { %500 = dma.done.wait (%p713_p11), %s167_s10, 128  }
  0x4b   : > { %502 = vsyncadd (%p713_p11), %s167_s10, 4294967168  ;;  %p714_p3 = scmp.eq.s32.totalorder %s565_s2, 0 }
  0x4d   : > { %504 = dma.done.wait (%p714_p3), [#allocation5], 32   ;;  %p715_p6 = pmov %p714_p3 }
  0x4e   : > { %v525_v0 = vmov 0   ;;  %v201_v1 = vld [vmem:[%s170_s11] sm:$0xff]  ;;  %vm213_vm0 = vcmask 1041408   ;;  %v202_v7 = vld [vmem:[#allocation4] sm:$0x3]  ;;  %vm209_vm1 = vcmask 31744  }
  0x4f   : > { %506 = vsyncadd (%p715_p6), [#allocation5], 4294967264  ;;  %252 = vmatprep.mubr.bf16.mxu0 %v525_v0  ;;  %v203_v2 = vmax.f32 %v201_v1, 0.0  ;;  %vm261_vm2 = vcmask 1043456   ;;  %p196_p7 = scmp.lt.s32.totalorder %s565_s2, 1  ;;  %vm279_vm3 = vcmask 7168  }
  0x50   : > { %vm281_vm4 = vcmask 11264  }
  0x51   : > { %v205_v3 = vcombine.high %v203_v2, %v203_v2  ;;  %v207_v4 = vpack.c.bf16 %v203_v2, %v203_v2  ;;  %s721_s2 = smov (!%p196_p7, %s565_s2), 1 }
  0x52   : > { %s368_s16 = sshll.u32 %s721_s2, 2 }
  0x53   : > { %v208_v5 = vpack.c.bf16 %v205_v3, %v205_v3  ;;  %v215_v6 = vsel %vm213_vm0, %v207_v4, 0  ;;  %s199_s18 = scalar_lea.vmem %s701_s3, %s368_s16 }
  0x55   : > { %369 = vmatprep.subr.msk.bf16.mxu0 %vm213_vm0, %v208_v5 }
  0x56   : > { %221 = vmatpush1.bf16.msra.mxu0 %v215_v6 }
  0x59   : > { %370 = vmatmul.mubr.msk.bf16.vlgmr.msra.gmra.mrb[0].mxu0 %vm209_vm1, %v202_v7 }
 0x12c   : > { %v254_v8 = vpop.f32.mrb[0].mxu0 }
 0x12d   : > { %v256_v9 = vpop.f32.mrb[1].mxu0  ;;  %v262_v10 = vsel %vm261_vm2, %v254_v8, 0.0 }
 0x12e   : > { %v258_v11 = vpop.f32.mrb[2].mxu0  ;;  %v263_v12 = vsel %vm261_vm2, %v256_v9, 0.0 }
 0x12f   : > { %v259_v13 = vpop.f32.mrb[3].mxu0  ;;  %v264_v14 = vadd.f32 %v263_v12, %v262_v10 }
 0x131   : > { %265 = vadd.xlane.f32.xlu0 %v264_v14 }
 0x1be   : > { %v266_v15 = vpop.xlane.xlu0 %265 }
 0x1bf   : > { %v268_v16 = vmul.f32 0.00390625, %v266_v15 }
 0x1c1   : > { %v269_v17 = vsub.f32 %v254_v8, %v268_v16  ;;  %v270_v18 = vsub.f32 %v256_v9, %v268_v16 }
 0x1c3   : > { %v271_v19 = vmul.f32 %v269_v17, %v269_v17  ;;  %v272_v20 = vmul.f32 %v270_v18, %v270_v18 }
 0x1c5   : > { %v273_v21 = vsel %vm261_vm2, %v271_v19, 0.0  ;;  %v274_v22 = vsel %vm261_vm2, %v272_v20, 0.0 }
 0x1c6   : > { %v275_v23 = vadd.f32 %v274_v22, %v273_v21 }
 0x1c8   : > { %276 = vadd.xlane.f32.xlu0 %v275_v23 }
 0x255   : > { %v277_v24 = vpop.xlane.xlu0 %276 }
 0x256   : > { %v280_v25 = vsel %vm279_vm3, %v266_v15, %v277_v24 }
 0x257   : > { %282 = vst.msk [vmem:[%s199_s18] sm:$0xf] %vm281_vm4, %v280_v25 }
 0x258 PF: > { %p14_p10 = scmp.ge.s32.totalorder %s584_s20, 4   ;;  %s716_s12 = smov %s513_s13 }
 0x259   : > { %s717_s13 = smov %s517_s14  ;;  %s718_s14 = smov %s620_s8 }
 0x25a   : > { %s719_s15 = smov %s584_s20  ;;  %16 = sbr.rel (!%p14_p10) target bundleno = 4 (0x4), region = 76 }
 0x261   :  { %302 = vsyncpa [#allocation3], 1 }
 0x262   :  { %304 = vsyncpa [#allocation3 + $0x1], 1 }
 0x263   :  { %305 = vsyncpa [#allocation5], 1 }

</bundles_post_ra>
